<compile_context>
chip_gen: v6e
topology: v6e:2x2x1
jax: 0.10.0
libtpu: 0.0.40
codegen_flags: <defaults>
</compile_context>

<pallas_src>
import jax
import jax.numpy as jnp
from jax import lax
from jax.experimental import pallas as pl
from jax.experimental.pallas import tpu as pltpu

_LANE = 128
_SUBLANE = 8
_TARGET_BLOCK_BYTES = 1 << 20  # ~1 MiB per buffer; 4x (double-buffered in+out)
                               # stays well inside v5e/v6e/v7x scoped VMEM.


def _frozen_bn_kernel(scale_ref, bias_ref, x_ref, o_ref):
    # scale_ref / bias_ref: (Cb, 1) f32; x_ref / o_ref: (1, Cb, Ts).
    # Broadcast once per grid step across the lane (spatial) axis; single
    # fused multiply-add per vreg keeps the kernel DMA-bound.
    scale = scale_ref[...][None, :, :]   # (1, Cb, 1)
    shift = bias_ref[...][None, :, :]    # (1, Cb, 1)
    o_ref[...] = (x_ref[...] * scale + shift).astype(o_ref.dtype)


def _spatial_tile(hw):
    """Lane-dense spatial tile: multiple of 128 that divides HW, else full HW."""
    if hw % _LANE != 0:
        return hw  # full dim (== array dim, so the (8,128) rule is satisfied)
    t = min(hw, 16 * _LANE)  # up to 2048 lanes
    while hw % t != 0:
        t -= _LANE
    return t


def _channel_tile(c, ts, itemsize):
    """Channel tile: multiple of 8 dividing C, sized for ~1 MiB blocks."""
    if c % _SUBLANE != 0:
        return c  # full dim
    cb = (_TARGET_BLOCK_BYTES // max(ts * itemsize, 1)) // _SUBLANE * _SUBLANE
    cb = max(_SUBLANE, min(cb, c))
    while c % cb != 0:
        cb -= _SUBLANE
    return cb


def frozen_batch_norm_2d(x, weight, bias, running_mean, running_var, eps=1e-05):
    """x: [N, C, H, W]; weight/bias/running_mean/running_var: [C]."""
    N, C, H, W = x.shape
    HW = H * W

    # Precompute per-channel affine in f32 (runs once, O(C)).
    w32 = weight.astype(jnp.float32)
    b32 = bias.astype(jnp.float32)
    rm32 = running_mean.astype(jnp.float32)
    rv32 = running_var.astype(jnp.float32)
    scale = w32 * lax.rsqrt(rv32 + eps)
    shift = b32 - rm32 * scale
    scale = scale.reshape(C, 1)
    shift = shift.reshape(C, 1)

    # Lane-dense layout: flatten spatial dims (free for contiguous NCHW).
    x3 = x.reshape(N, C, HW)

    ts = _spatial_tile(HW)
    cb = _channel_tile(C, ts, x.dtype.itemsize)
    grid = (N, C // cb, HW // ts)

    out3 = pl.pallas_call(
        _frozen_bn_kernel,
        out_shape=jax.ShapeDtypeStruct((N, C, HW), x.dtype),
        grid=grid,
        in_specs=[
            pl.BlockSpec((cb, 1), lambda n, c, s: (c, 0)),        # scale (VMEM)
            pl.BlockSpec((cb, 1), lambda n, c, s: (c, 0)),        # bias  (VMEM)
            pl.BlockSpec((1, cb, ts), lambda n, c, s: (n, c, s)),  # x
        ],
        out_specs=pl.BlockSpec((1, cb, ts), lambda n, c, s: (n, c, s)),
        compiler_params=pltpu.CompilerParams(
            dimension_semantics=("parallel", "parallel", "parallel"),
            vmem_limit_bytes=32 * 1024 * 1024,
        ),
    )(scale, shift, x3)

    return out3.reshape(N, C, H, W)


if __name__ == "__main__":
    key = jax.random.PRNGKey(0)
    N, C, H, W = 2, 4, 16, 16

    kx, kw, kb, km, kv = jax.random.split(key, 5)
    x = jax.random.normal(kx, (N, C, H, W), dtype=jnp.float32)

    # Deterministic "frozen" params (module defaults perturbed so the affine
    # transform is non-trivial).
    weight = jnp.ones((C,), jnp.float32) + 0.1 * jax.random.normal(kw, (C,))
    bias = jnp.zeros((C,), jnp.float32) + 0.1 * jax.random.normal(kb, (C,))
    running_mean = 0.1 * jax.random.normal(km, (C,))
    running_var = jnp.ones((C,), jnp.float32) + 0.1 * jnp.abs(
        jax.random.normal(kv, (C,))
    )

    out = frozen_batch_norm_2d(x, weight, bias, running_mean, running_var)
    out = jax.block_until_ready(out)

    # Pure-JAX reference (mirrors the PyTorch forward exactly).
    eps = 1e-05
    scale_ref = (weight * lax.rsqrt(running_var + eps)).reshape(1, C, 1, 1)
    bias_ref = bias.reshape(1, C, 1, 1) - running_mean.reshape(1, C, 1, 1) * scale_ref
    ref = x * scale_ref + bias_ref

    assert out.shape == (N, C, H, W)
    assert out.dtype == x.dtype
    assert jnp.allclose(out, ref, atol=1e-5, rtol=1e-5), (
        float(jnp.max(jnp.abs(out - ref)))
    )
    print("KERNEL_OK")
</pallas_src>

<mosaic_0001>
module attributes {stable_mosaic.version = 11 : i64} {
  func.func @_frozen_bn_kernel(%arg0: i32, %arg1: i32, %arg2: i32, %arg3: memref<4x1xf32, #tpu.memory_space<vmem>>, %arg4: memref<4x1xf32, #tpu.memory_space<vmem>>, %arg5: memref<1x4x256xf32, #tpu.memory_space<vmem>>, %arg6: memref<1x4x256xf32, #tpu.memory_space<vmem>>) attributes {dimension_semantics = [#tpu.dimension_semantics<parallel>, #tpu.dimension_semantics<parallel>, #tpu.dimension_semantics<parallel>], iteration_bounds = array<i64: 2, 1, 1>, scalar_prefetch = 0 : i64, scratch_operands = 0 : i64, tpu.core_type = #tpu.core_type<tc>, window_params = [{transform_indices = @transform_0, window_bounds = array<i64: 4, 1>}, {transform_indices = @transform_1, window_bounds = array<i64: 4, 1>}, {transform_indices = @transform_2, window_bounds = array<i64: 1, 4, 256>}, {transform_indices = @transform_3, window_bounds = array<i64: 1, 4, 256>}]} {
    %c0 = arith.constant 0 : index
    %c0_0 = arith.constant 0 : index
    %0 = vector.load %arg3[%c0, %c0_0] : memref<4x1xf32, #tpu.memory_space<vmem>>, vector<4x1xf32>
    %1 = vector.shape_cast %0 : vector<4x1xf32> to vector<1x4x1xf32>
    %c0_1 = arith.constant 0 : index
    %c0_2 = arith.constant 0 : index
    %2 = vector.load %arg4[%c0_1, %c0_2] : memref<4x1xf32, #tpu.memory_space<vmem>>, vector<4x1xf32>
    %3 = vector.shape_cast %2 : vector<4x1xf32> to vector<1x4x1xf32>
    %c0_3 = arith.constant 0 : index
    %c0_4 = arith.constant 0 : index
    %c0_5 = arith.constant 0 : index
    %4 = vector.load %arg5[%c0_3, %c0_4, %c0_5] : memref<1x4x256xf32, #tpu.memory_space<vmem>>, vector<1x4x256xf32>
    %5 = vector.broadcast %1 : vector<1x4x1xf32> to vector<1x4x256xf32>
    %6 = arith.mulf %4, %5 : vector<1x4x256xf32>
    %7 = vector.broadcast %3 : vector<1x4x1xf32> to vector<1x4x256xf32>
    %8 = arith.addf %6, %7 : vector<1x4x256xf32>
    %c0_6 = arith.constant 0 : index
    %c0_7 = arith.constant 0 : index
    %c0_8 = arith.constant 0 : index
    %9 = vector.load %arg6[%c0_6, %c0_7, %c0_8] : memref<1x4x256xf32, #tpu.memory_space<vmem>>, vector<1x4x256xf32>
    tpu.vector_store %arg6[%c0_6, %c0_7, %c0_8], %8 {strides = array<i32>} : memref<1x4x256xf32, #tpu.memory_space<vmem>>, vector<1x4x256xf32>,
    return
  }
  func.func @transform_0(%arg0: i32, %arg1: i32, %arg2: i32) -> (i32, i32) {
    %c0_i32 = arith.constant 0 : i32
    %c0_i32_0 = arith.constant 0 : i32
    return %arg1, %c0_i32 : i32, i32
  }
  func.func @transform_1(%arg0: i32, %arg1: i32, %arg2: i32) -> (i32, i32) {
    %c0_i32 = arith.constant 0 : i32
    %c0_i32_0 = arith.constant 0 : i32
    return %arg1, %c0_i32 : i32, i32
  }
  func.func @transform_2(%arg0: i32, %arg1: i32, %arg2: i32) -> (i32, i32, i32) {
    %c0_i32 = arith.constant 0 : i32
    return %arg0, %arg1, %arg2 : i32, i32, i32
  }
  func.func @transform_3(%arg0: i32, %arg1: i32, %arg2: i32) -> (i32, i32, i32) {
    %c0_i32 = arith.constant 0 : i32
    return %arg0, %arg1, %arg2 : i32, i32, i32
  }
}

</mosaic_0001>

<bundles_post_ra>
// kernel: tpu_custom_call.1
= control target key start
LH: loop header
LB: loop body
LE: loop exit
PB: predicated region body
PF: predicated region fallthrough
CT: control target
= control target key end

     0   :  { %8 = vsyncpa [#allocation3], 0  ;;  %s782_s0 = inlined_call_operand.vmem [shape: f32[4,1], index: 0, kind: input, shape index: {}]   ;;  %s783_s1 = inlined_call_operand.vmem [shape: f32[4,1], index: 1, kind: input, shape index: {}]   ;;  %s784_s2 = inlined_call_operand.hbm [shape: f32[2,4,256], index: 2, kind: input, shape index: {}]   ;;  %s785_s3 = inlined_call_operand.hbm [shape: f32[2,4,256], index: 3, kind: output, shape index: {}]  }
   0x1   :  { %10 = vsyncpa [#allocation3 + $0x1], 0 }
   0x2   :  { %11 = vsyncpa [#allocation4], 0 }
   0x3   :  { %13 = vsyncpa [#allocation4 + $0x1], 0  ;;  %s642_s12 = smov 0   ;;  %s644_s13 = smov 0  }
   0x4   :  { %s646_s14 = smov 0   ;;  %s648_s15 = smov 0  }
   0x5   :  { %s650_s16 = smov 0   ;;  %s652_s17 = smov 0  }
   0x6 LB: > { %s424_s18 = sadd.s32 4294967295, %s616_s17   ;;  %s425_s19 = sadd.s32 4294967294, %s616_s17   ;;  %s616_s17 = sphi %s652_s17, %s19_s17   ;;  %s612_s16 = sphi %s650_s16, %s797_s16   ;;  %s608_s15 = sphi %s648_s15, %s796_s15   ;;  %s604_s14 = sphi %s646_s14, %s795_s14   ;;  %s600_s13 = sphi %s644_s13, %s794_s13   ;;  %s596_s12 = sphi %s642_s12, %s793_s12  }
   0x7   : > { %s38_s20 = sadd.s32 1, %s612_s16  ;;  %s101_s21 = sadd.s32 1, %s604_s14 }
   0x8   : > { %p40_p0 = scmp.ge.s32.totalorder %s38_s20, 2  ;;  %p108_p1 = scmp.ne.s32.totalorder %s604_s14, %s600_s13 }
   0x9   : > { %p109_p2 = scmp.eq.s32.totalorder %s616_s17, 0  ;;  %p114_p3 = scmp.ne.s32.totalorder %s600_s13, %s596_s12 }
   0xa   : > { %s799_s20 = smov (%p40_p0, %s38_s20), 0  ;;  %p115_p5 = scmp.eq.s32.totalorder %s424_s18, 0 }
   0xb   : > { %p683_p4 = por %p109_p2, %p108_p1  ;;  %s94_s23 = ssub.s32 %s612_s16, %s799_s20 }
   0xc   : > { %p142_p6 = scmp.eq.s32.totalorder %s424_s18, 1  ;;  %p99_p7 = scmp.eq.s32.totalorder %s94_s23, 0 }
   0xd   : > { %p689_p8 = por %p115_p5, %p114_p3  ;;  %p148_p10 = scmp.eq.s32.totalorder %s425_s19, 1 }
   0xe   : > { %p693_p9 = por %p142_p6, %p108_p1  ;;  %p455_p13 = scmp.lt.s32.totalorder %s616_s17, 2 }
   0xf   : > { %s698_s26 = scalar_select %p99_p7, %s604_s14, %s101_s21  }
  0x10   : > { %p700_p11 = por %p148_p10, %p114_p3  ;;  %s182_s28 = sand.u32 1, %s604_s14  }
  0x11   : > { %s430_s29 = sshll.u32 %s182_s28, 3  ;;  %s441_s30 = sshll.u32 %s612_s16, 7 }
  0x12   : > { %s789_s27 = scalar_select %p700_p11, 1, 0 }
  0x13   : > { %s196_s6 = scalar_lea.hbm %s784_s2, %s441_s30  ;;  %s186_s7 = scalar_lea.vmem [#allocation2], %s430_s29 }
  0x14   : > { %s198_s8 = sshll.u32 %s186_s7, 4  ;;  %p713_p0 = pnand %p455_p13, %p683_p4  ;;  %s199_s8 = int_to_ptr.vmem [resolvable:$true] %s198_s8 }
  0x15   : > { %p433_p1 = scmp.ge.s32.totalorder %s616_s17, 1  ;;  %p203_p2 = scmp.lt.s32.totalorder %s616_s17, 3 }
  0x16   : > { %s183_s10 = scalar_lea.sflag [#allocation3], %s182_s28  ;;  %p510_p3 = pneg %p713_p0 }
  0x17   : > { %s521_s11 = scalar_lea.vmem %s199_s8, 128  ;;  %s618_s18 = smov [#allocation2]  }
  0x18   : > { %p522_p5 = scmp.ne.s32.totalorder %s199_s8, %s521_s11  ;;  %s526_s19 = sshll.u32 %s618_s18, 4  ;;  %s527_s19 = int_to_ptr.vmem [resolvable:$false] %s526_s19 }
  0x19   : > { %s528_s21 = scalar_lea.vmem %s527_s19, 256  ;;  %p529_p10 = scmp.lt.s32.totalorder %s199_s8, %s527_s19 }
  0x1a   : > { %p524_p6 = pnand %p522_p5, %p510_p3  ;;  %p530_p12 = scmp.lt.s32.totalorder %s528_s21, %s521_s11 }
  0x1c   : > { %p525_p7 = pneg %p524_p6  ;;  %p531_p4 = por %p530_p12, %p529_p10 }
  0x1e   : > { %p532_p13 = pnand %p531_p4, %p525_p7 }
  0x20   : > { %535 = shalt.err (!%p532_p13)
}
  0x21   : > { %450 = dma.hbm_to_vmem [thread:$0]  (!%p713_p0), %s196_s6, 128, %s199_s8, %s183_s10  }
  0x22   : > { %p204_p11 = pnand %p433_p1, %p203_p2 }
  0x23   : > { %s728_s22 = sand.u32 (!%p204_p11), 1, %s600_s13  }
  0x24   : > { %207 = sbr.rel (%p204_p11) target bundleno = 189 (0xbd), region = 32  ;;  %s434_s23 = sshll.u32 (!%p204_p11), %s728_s22, 3 }
  0x25   : > { %s210_s28 = scalar_lea.sflag (!%p204_p11), [#allocation3], %s728_s22  ;;  %s213_s29 = scalar_lea.vmem (!%p204_p11), [#allocation2], %s434_s23 }
  0x29   : > { %587 = dma.done.wait (%p689_p8), %s210_s28, 128  }
  0x2a   : > { %589 = vsyncadd (%p689_p8), %s210_s28, 4294967168  ;;  %v619_v0 = vmov 0   ;;  %v254_v1 = vld [vmem:[%s782_s0] sm:$0xf]  ;;  %v620_v3 = vmov 839922192   ;;  %v264_v5 = vlaneseq }
  0x2b   : > { %507 = vset.pattern.permute.xlu0 %v619_v0  ;;  %v255_v2 = vld [vmem:[%s783_s1] sm:$0xf]  ;;  %v262_v4 = vunpack.c.l.s4 %v620_v3  ;;  %s442_s24 = sshll.u32 %s608_s15, 7  ;;  %s243_s7 = scalar_lea.vmem [#allocation5], %s434_s23 }
  0x2c   : > { %259 = vperm.xlu0 %507, %v254_v1   ;;  %v265_v7 = vshrl.u32 %v264_v5, 7  ;;  %v256_v11 = vld [vmem:[%s213_s29] sm:$0xff]  ;;  %s303_s8 = sshll.u32 %s243_s7, 4  ;;  %s301_s11 = scalar_lea.hbm %s785_s3, %s442_s24  ;;  %s304_s8 = int_to_ptr.vmem [resolvable:$true] %s303_s8 }
  0x2d   : > { %v263_v6 = vunpack.c.0.s8 %v262_v4  ;;  %s285_s18 = scalar_lea.sflag [#allocation4], %s728_s22  ;;  %s536_s19 = scalar_lea.vmem %s304_s8, 128 }
  0x2e   : > { %p537_p8 = scmp.ne.s32.totalorder %s304_s8, %s536_s19  ;;  %s621_s21 = smov [#allocation5]  }
  0x2f   : > { %v266_v8 = vsub.s32 %v263_v6, %v265_v7  ;;  %s540_s28 = sshll.u32 %s621_s21, 4  ;;  %s541_s28 = int_to_ptr.vmem [resolvable:$false] %s540_s28 }
  0x30   : > { %272 = vperm.xlu0 %507, %v255_v2   ;;  %p538_p11 = pnand %p537_p8, %p693_p9  ;;  %s542_s15 = scalar_lea.vmem %s541_s28, 256 }
  0x31   : > { %p543_p0 = scmp.lt.s32.totalorder %s304_s8, %s541_s28  ;;  %p544_p1 = scmp.lt.s32.totalorder %s542_s15, %s536_s19 }
  0x32   : > { %p539_p12 = pneg %p538_p11 }
  0x33   : > { %p545_p2 = por %p544_p1, %p543_p0 }
  0x35   : > { %p546_p3 = pnand %p545_p2, %p539_p12 }
  0xa7   : > { %v260_v9 = vpop.permute.xlu0 %259 }
  0xa8   : > { %v267_v10 = vrot.slane %v260_v9, %v266_v8 }
  0xaa   : > { %v269_v13 = vmul.f32 %v267_v10, %v256_v11 }
  0xab   : > { %v273_v12 = vpop.permute.xlu0 %272 }
  0xac   : > { %v280_v14 = vrot.slane %v273_v12, %v266_v8 }
  0xae   : > { %v282_v15 = vadd.f32 %v280_v14, %v269_v13 }
  0xb0   : > { %283 = vst [vmem:[%s243_s7] sm:$0xff] %v282_v15 }
  0xb1   : > { %549 = shalt.err (!%p546_p3)
}
  0xb2   : > { %s550_s23 = scalar_lea.hbm %s301_s11, 128  ;;  %s554_s30 = scalar_lea.hbm %s785_s3, 256 }
  0xb3   : > { %p551_p5 = scmp.ne.s32.totalorder %s301_s11, %s550_s23  ;;  %p555_p10 = scmp.lt.s32.totalorder %s301_s11, %s785_s3 }
  0xb4   : > { %p556_p4 = scmp.lt.s32.totalorder %s554_s30, %s550_s23 }
  0xb5   : > { %p552_p6 = pnand %p551_p5, %p693_p9 }
  0xb6   : > { %p557_p13 = por %p556_p4, %p555_p10 }
  0xb7   : > { %p553_p7 = pneg %p552_p6 }
  0xb9   : > { %p558_p8 = pnand %p557_p13, %p553_p7 }
  0xbb   : > { %561 = shalt.err (!%p558_p8)
}
  0xbc   : > { %445 = dma.vmem_to_hbm [thread:$0]  (%p693_p9), %s304_s8, 128, %s301_s11, %s285_s18  }
  0xbd PF: > { %s315_s6 = sand.u32 1, %s596_s12   ;;  %p791_p11 = scmp.ne.s32.totalorder %s789_s27, 0 }
  0xbe   : > { %p792_p12 = scmp.ge.s32.totalorder %s616_s17, 2  ;;  %s316_s24 = scalar_lea.sflag [#allocation4], %s315_s6 }
  0xc0   : > { %p452_p0 = pnand %p792_p12, %p791_p11 }
  0xc2   : > { %p453_p1 = pneg %p452_p0 }
  0xc4   : > { %591 = dma.done.wait (%p453_p1), %s316_s24, 128  }
  0xc5   : > { %593 = vsyncadd (%p453_p1), %s316_s24, 4294967168  ;;  %s19_s17 = sadd.s32 1, %s616_s17   ;;  %s793_s12 = smov %s600_s13 }
  0xc6   : > { %p16_p2 = scmp.ge.s32.totalorder %s19_s17, 4   ;;  %s794_s13 = smov %s604_s14 }
  0xc7   : > { %s795_s14 = smov %s698_s26  ;;  %s796_s15 = smov %s612_s16 }
  0xc8   : > { %s797_s16 = smov %s799_s20  ;;  %18 = sbr.rel (!%p16_p2) target bundleno = 6 (0x6), region = 83 }
  0xcd   :  { %321 = vsyncpa [#allocation3], 1 }
  0xce   :  { %323 = vsyncpa [#allocation3 + $0x1], 1 }
  0xcf   :  { %324 = vsyncpa [#allocation4], 1 }
  0xd0   :  { %326 = vsyncpa [#allocation4 + $0x1], 1 }

</bundles_post_ra>
